<compile_context>
chip_gen: v6e
topology: v6e:2x2x1
jax: 0.10.0
libtpu: 0.0.40
codegen_flags: <defaults>
</compile_context>

<pallas_src>
import numpy as np
import jax
import jax.numpy as jnp
from jax import lax
from jax.experimental import pallas as pl
from jax.experimental.pallas import tpu as pltpu


# (output parity, input offset) -> transposed-conv kernel tap, from
#   o = 2*i - pad + k  (stride=2, pad=1, K=4)  =>  k = parity + 1 - 2*offset
#   parity 0: offset  0 -> k=1, offset -1 -> k=3
#   parity 1: offset +1 -> k=0, offset  0 -> k=2
_TAP_OF = {(0, 0): 1, (0, -1): 3, (1, 1): 0, (1, 0): 2}


def _pack_weight(weight, W):
    """(Cin, Cout, 4, 4) ConvTranspose2d weight -> (3, (W+2)*C, 4*W*C) banded matrices.

    w_pack[dy+1, jin*C + ci, py*(2*W*C) + (2*jout + px)*C + co] is the weight mapping
    padded-input pixel xpad[i + dy + 1, jin, ci] to output pixel
    y[2*i + py, 2*jout + px, co].  Width taps, channel mixing and the zero halo are all
    folded into the band structure, so the kernel does dense matmuls only.
    """
    C = weight.shape[0]
    n_out = 2 * W * C                                   # output lanes per row parity
    w_pack = jnp.zeros((3, (W + 2) * C, 2 * n_out), weight.dtype)
    jout = np.arange(W)
    for (py, dy), ky in _TAP_OF.items():
        for (px, dx), kx in _TAP_OF.items():
            sel = np.zeros((W + 2, 2 * W), np.float32)  # static band selector
            sel[jout + dx + 1, 2 * jout + px] = 1.0
            block = jnp.kron(jnp.asarray(sel, weight.dtype), weight[:, :, ky, kx])
            w_pack = w_pack.at[dy + 1, :, py * n_out:(py + 1) * n_out].add(block)
    return w_pack


def _upsample_kernel(x_ref, w_ref, b_ref, o_ref):
    # x_ref: (1, H+2, (W+2)*C)   zero-padded, lane-flattened input (one batch element)
    # w_ref: (3, (W+2)*C, 4*W*C) banded matmul weight, one slice per input-row offset
    # b_ref: (1, 4*W*C)          bias tiled in output-lane order (py, px, jout, co)
    # o_ref: (1, 2, H, 2*W*C)    o_ref[0, py, i, (2*j+px)*C + c] == y[2*i+py, 2*j+px, c]
    H = o_ref.shape[2]
    n_out = o_ref.shape[3]                              # 2*W*C (multiple of 128 here)

    # Three dense MXU matmuls, one per input-row offset dy in {-1, 0, +1}.  The LHS
    # windows differ only by a sublane base offset (no lane movement); the chained +=
    # keeps a single f32 accumulator (only a few vregs at this size, MRB-friendly).
    acc = jnp.zeros((H, 2 * n_out), jnp.float32)
    for d in range(3):
        acc = acc + jnp.dot(x_ref[0, d:d + H, :], w_ref[d],
                            preferred_element_type=jnp.float32)
    acc = acc + b_ref[...].astype(jnp.float32)          # bias added exactly once

    # Full-width lane-dense stores: one (H, 2*W*C) slab per output-row parity.
    o_ref[0, 0] = acc[:, :n_out].astype(o_ref.dtype)
    o_ref[0, 1] = acc[:, n_out:].astype(o_ref.dtype)


@jax.jit
def upsample_forward(x_nchw, weight, bias, t=None):
    """Forward of UpSample: ConvTranspose2d(C, C, 4, stride=2, padding=1).

    x_nchw: (N, C, H, W) float32   weight: (Cin, Cout, 4, 4)   bias: (Cout,)
    t: ignored (matches the PyTorch forward signature).
    Returns (N, C, 2H, 2W).
    """
    del t
    N, C, H, W = x_nchw.shape

    # Single unavoidable input relayout (the module API is NCHW): transpose -> lane
    # flatten -> fold the 1-pixel halo into the same op, so the kernel needs no padded
    # scratch, no zeroing, and no misaligned interior stores.
    x_flat = jnp.transpose(x_nchw, (0, 2, 3, 1)).reshape(N, H, W * C)
    x_pad = jnp.pad(x_flat, ((0, 0), (1, 1), (C, C)))   # (N, H+2, (W+2)*C)

    w_k = _pack_weight(weight, W)                       # (3, (W+2)*C, 4*W*C)
    b_k = jnp.tile(bias, 4 * W)[None, :]                # (1, 4*W*C)

    # TODO(synk): for large H/W/C add an H-tile grid axis (re-deriving the halo per
    # tile), keep 2*W*C a multiple of 128 (pad if needed), cast matmul operands to
    # bf16 on v6e/v7x, and set vmem_limit_bytes for v7x's 64 MiB VMEM.
    out = pl.pallas_call(
        _upsample_kernel,
        out_shape=jax.ShapeDtypeStruct((N, 2, H, 2 * W * C), x_nchw.dtype),
        grid_spec=pltpu.PrefetchScalarGridSpec(
            num_scalar_prefetch=0,
            grid=(N,),
            in_specs=[
                pl.BlockSpec((1, H + 2, (W + 2) * C), lambda n: (n, 0, 0)),
                pl.BlockSpec((3, (W + 2) * C, 4 * W * C), lambda n: (0, 0, 0)),
                pl.BlockSpec((1, 4 * W * C), lambda n: (0, 0)),
            ],
            out_specs=pl.BlockSpec((1, 2, H, 2 * W * C), lambda n: (n, 0, 0, 0)),
        ),
        compiler_params=pltpu.CompilerParams(
            dimension_semantics=("parallel",)),
    )(x_pad, w_k, b_k)

    # (N, 2, H, 2W*C) -> (N, 2, H, 2W, C) is a free reshape (lanes are already ox-major,
    # channel-minor); one transpose converts back to NCHW to match the PyTorch module.
    out = out.reshape(N, 2, H, 2 * W, C)
    y = jnp.transpose(out, (0, 4, 2, 1, 3)).reshape(N, C, 2 * H, 2 * W)
    return y


def _reference_upsample(x_nchw, weight, bias):
    """Pure-JAX reference for ConvTranspose2d(k=4, s=2, p=1) in NCHW."""
    K, p = 4, 1
    w_flip = weight[:, :, ::-1, ::-1]                   # flip spatial
    w_conv = jnp.transpose(w_flip, (1, 0, 2, 3))        # (Cout, Cin, kH, kW)
    y = lax.conv_general_dilated(
        x_nchw, w_conv,
        window_strides=(1, 1),
        padding=((K - 1 - p, K - 1 - p), (K - 1 - p, K - 1 - p)),
        lhs_dilation=(2, 2),
        rhs_dilation=(1, 1),
        dimension_numbers=("NCHW", "OIHW", "NCHW"))
    return y + bias[None, :, None, None]


if __name__ == "__main__":
    key = jax.random.PRNGKey(0)
    kx, kw, kb, kt = jax.random.split(key, 4)

    N, C, H, W = 2, 4, 16, 16
    x = jax.random.normal(kx, (N, C, H, W), dtype=jnp.float32)
    weight = 0.1 * jax.random.normal(kw, (C, C, 4, 4), dtype=jnp.float32)
    bias = 0.1 * jax.random.normal(kb, (C,), dtype=jnp.float32)
    t_emb = jax.random.normal(kt, (N, 32), dtype=jnp.float32)  # ignored, like PyTorch forward

    y = upsample_forward(x, weight, bias, t_emb)
    y = jax.block_until_ready(y)

    assert y.shape == (N, C, 2 * H, 2 * W), y.shape

    y_ref = _reference_upsample(x, weight, bias)
    err = jnp.max(jnp.abs(y - y_ref))
    assert err < 1e-4, f"max abs error {err}"

    print("KERNEL_OK")
</pallas_src>

<mosaic_0001>
module attributes {stable_mosaic.version = 11 : i64} {
  func.func @_upsample_kernel(%arg0: i32, %arg1: memref<1x18x72xf32, #tpu.memory_space<vmem>>, %arg2: memref<3x72x256xf32, #tpu.memory_space<vmem>>, %arg3: memref<1x256xf32, #tpu.memory_space<vmem>>, %arg4: memref<1x2x16x128xf32, #tpu.memory_space<vmem>>) attributes {dimension_semantics = [#tpu.dimension_semantics<parallel>], iteration_bounds = array<i64: 2>, scalar_prefetch = 0 : i64, scratch_operands = 0 : i64, tpu.core_type = #tpu.core_type<tc>, window_params = [{transform_indices = @transform_0, window_bounds = array<i64: 1, 18, 72>}, {pipeline_mode = #tpu.pipeline_mode<synchronous>, transform_indices = @transform_1, window_bounds = array<i64: 3, 72, 256>}, {pipeline_mode = #tpu.pipeline_mode<synchronous>, transform_indices = @transform_2, window_bounds = array<i64: 1, 256>}, {transform_indices = @transform_3, window_bounds = array<i64: 1, 2, 16, 128>}]} {
    %cst = arith.constant 0.000000e+00 : f32
    %0 = vector.broadcast %cst : f32 to vector<16x256xf32>
    %c0 = arith.constant 0 : index
    %c0_0 = arith.constant 0 : index
    %c0_1 = arith.constant 0 : index
    %1 = vector.load %arg1[%c0, %c0_0, %c0_1] : memref<1x18x72xf32, #tpu.memory_space<vmem>>, vector<1x16x72xf32>
    %2 = vector.shape_cast %1 : vector<1x16x72xf32> to vector<16x72xf32>
    %c0_2 = arith.constant 0 : index
    %c0_3 = arith.constant 0 : index
    %c0_4 = arith.constant 0 : index
    %3 = vector.load %arg2[%c0_2, %c0_3, %c0_4] : memref<3x72x256xf32, #tpu.memory_space<vmem>>, vector<1x72x256xf32>
    %4 = vector.shape_cast %3 : vector<1x72x256xf32> to vector<72x256xf32>
    %cst_5 = arith.constant dense<0.000000e+00> : vector<16x256xf32>
    %5 = tpu.matmul %2, %4, %cst_5 {dimension_numbers = #tpu.dot_dimension_numbers<[1], [0], [0], [1], [0, 0, 1, 1], [], []>} : vector<16x72xf32>, vector<72x256xf32>, vector<16x256xf32> -> vector<16x256xf32>
    %6 = arith.addf %0, %5 : vector<16x256xf32>
    %c0_6 = arith.constant 0 : index
    %c1 = arith.constant 1 : index
    %c0_7 = arith.constant 0 : index
    %7 = vector.load %arg1[%c0_6, %c1, %c0_7] : memref<1x18x72xf32, #tpu.memory_space<vmem>>, vector<1x16x72xf32>
    %8 = vector.shape_cast %7 : vector<1x16x72xf32> to vector<16x72xf32>
    %c1_8 = arith.constant 1 : index
    %c0_9 = arith.constant 0 : index
    %c0_10 = arith.constant 0 : index
    %9 = vector.load %arg2[%c1_8, %c0_9, %c0_10] : memref<3x72x256xf32, #tpu.memory_space<vmem>>, vector<1x72x256xf32>
    %10 = vector.shape_cast %9 : vector<1x72x256xf32> to vector<72x256xf32>
    %cst_11 = arith.constant dense<0.000000e+00> : vector<16x256xf32>
    %11 = tpu.matmul %8, %10, %cst_11 {dimension_numbers = #tpu.dot_dimension_numbers<[1], [0], [0], [1], [0, 0, 1, 1], [], []>} : vector<16x72xf32>, vector<72x256xf32>, vector<16x256xf32> -> vector<16x256xf32>
    %12 = arith.addf %6, %11 : vector<16x256xf32>
    %c0_12 = arith.constant 0 : index
    %c2 = arith.constant 2 : index
    %c0_13 = arith.constant 0 : index
    %13 = vector.load %arg1[%c0_12, %c2, %c0_13] : memref<1x18x72xf32, #tpu.memory_space<vmem>>, vector<1x16x72xf32>
    %14 = vector.shape_cast %13 : vector<1x16x72xf32> to vector<16x72xf32>
    %c2_14 = arith.constant 2 : index
    %c0_15 = arith.constant 0 : index
    %c0_16 = arith.constant 0 : index
    %15 = vector.load %arg2[%c2_14, %c0_15, %c0_16] : memref<3x72x256xf32, #tpu.memory_space<vmem>>, vector<1x72x256xf32>
    %16 = vector.shape_cast %15 : vector<1x72x256xf32> to vector<72x256xf32>
    %cst_17 = arith.constant dense<0.000000e+00> : vector<16x256xf32>
    %17 = tpu.matmul %14, %16, %cst_17 {dimension_numbers = #tpu.dot_dimension_numbers<[1], [0], [0], [1], [0, 0, 1, 1], [], []>} : vector<16x72xf32>, vector<72x256xf32>, vector<16x256xf32> -> vector<16x256xf32>
    %18 = arith.addf %12, %17 : vector<16x256xf32>
    %c0_18 = arith.constant 0 : index
    %c0_19 = arith.constant 0 : index
    %19 = vector.load %arg3[%c0_18, %c0_19] : memref<1x256xf32, #tpu.memory_space<vmem>>, vector<1x256xf32>
    %20 = vector.broadcast %19 : vector<1x256xf32> to vector<16x256xf32>
    %21 = arith.addf %18, %20 : vector<16x256xf32>
    %22 = vector.extract_strided_slice %21 {offsets = [0, 0], sizes = [16, 128], strides = [1, 1]} : vector<16x256xf32> to vector<16x128xf32>
    %c0_20 = arith.constant 0 : index
    %c0_21 = arith.constant 0 : index
    %c0_22 = arith.constant 0 : index
    %c0_23 = arith.constant 0 : index
    %23 = vector.load %arg4[%c0_20, %c0_21, %c0_22, %c0_23] : memref<1x2x16x128xf32, #tpu.memory_space<vmem>>, vector<1x1x16x128xf32>
    %24 = vector.shape_cast %23 : vector<1x1x16x128xf32> to vector<16x128xf32>
    %25 = vector.shape_cast %22 : vector<16x128xf32> to vector<1x1x16x128xf32>
    tpu.vector_store %arg4[%c0_20, %c0_21, %c0_22, %c0_23], %25 {strides = array<i32>} : memref<1x2x16x128xf32, #tpu.memory_space<vmem>>, vector<1x1x16x128xf32>,
    %26 = vector.extract_strided_slice %21 {offsets = [0, 128], sizes = [16, 128], strides = [1, 1]} : vector<16x256xf32> to vector<16x128xf32>
    %c0_24 = arith.constant 0 : index
    %c1_25 = arith.constant 1 : index
    %c0_26 = arith.constant 0 : index
    %c0_27 = arith.constant 0 : index
    %27 = vector.load %arg4[%c0_24, %c1_25, %c0_26, %c0_27] : memref<1x2x16x128xf32, #tpu.memory_space<vmem>>, vector<1x1x16x128xf32>
    %28 = vector.shape_cast %27 : vector<1x1x16x128xf32> to vector<16x128xf32>
    %29 = vector.shape_cast %26 : vector<16x128xf32> to vector<1x1x16x128xf32>
    tpu.vector_store %arg4[%c0_24, %c1_25, %c0_26, %c0_27], %29 {strides = array<i32>} : memref<1x2x16x128xf32, #tpu.memory_space<vmem>>, vector<1x1x16x128xf32>,
    return
  }
  func.func @transform_0(%arg0: i32) -> (i32, i32, i32) {
    %c0_i32 = arith.constant 0 : i32
    %c0_i32_0 = arith.constant 0 : i32
    %c0_i32_1 = arith.constant 0 : i32
    return %arg0, %c0_i32, %c0_i32_0 : i32, i32, i32
  }
  func.func @transform_1(%arg0: i32) -> (i32, i32, i32) {
    %c0_i32 = arith.constant 0 : i32
    %c0_i32_0 = arith.constant 0 : i32
    %c0_i32_1 = arith.constant 0 : i32
    %c0_i32_2 = arith.constant 0 : i32
    return %c0_i32, %c0_i32_0, %c0_i32_1 : i32, i32, i32
  }
  func.func @transform_2(%arg0: i32) -> (i32, i32) {
    %c0_i32 = arith.constant 0 : i32
    %c0_i32_0 = arith.constant 0 : i32
    %c0_i32_1 = arith.constant 0 : i32
    return %c0_i32, %c0_i32_0 : i32, i32
  }
  func.func @transform_3(%arg0: i32) -> (i32, i32, i32, i32) {
    %c0_i32 = arith.constant 0 : i32
    %c0_i32_0 = arith.constant 0 : i32
    %c0_i32_1 = arith.constant 0 : i32
    %c0_i32_2 = arith.constant 0 : i32
    return %arg0, %c0_i32, %c0_i32_0, %c0_i32_1 : i32, i32, i32, i32
  }
}

</mosaic_0001>

<bundles_post_ra>
// kernel: tile.8
= control target key start
LH: loop header
LB: loop body
LE: loop exit
PB: predicated region body
PF: predicated region fallthrough
CT: control target
= control target key end

     0   :  { %2 = vsyncpa [#allocation1], 0  ;;  %s63_s6 = smov [#allocation0]   ;;  %s101_s0 = inlined_call_operand.hbm [shape: f32[4], index: 0, kind: input, shape index: {}]   ;;  %s102_s1 = inlined_call_operand.vmem [shape: f32[64,4], index: 1, kind: output, shape index: {}]  }
   0x1   :  { %s9_s7 = sshll.u32 %s63_s6, 4  ;;  %s10_s7 = int_to_ptr.vmem [resolvable:$true] %s9_s7 }
   0x2   :  { %s49_s8 = scalar_lea.vmem %s10_s7, 16  ;;  %s53_s9 = scalar_lea.vmem %s10_s7, 32 }
   0x3   :  { %p50_p0 = scmp.ne.s32.totalorder %s10_s7, %s49_s8  ;;  %p54_p1 = scmp.lt.s32.totalorder %s10_s7, %s10_s7 }
   0x4   :  { %p55_p2 = scmp.lt.s32.totalorder %s53_s9, %s49_s8 }
   0x6   :  { %p56_p3 = por %p55_p2, %p54_p1 }
   0x8   :  { %p57_p4 = pnand %p56_p3, %p50_p0 }
   0xa   :  { %60 = shalt.err (!%p57_p4)
}
   0xb   :  { %12 = dma.hbm_to_vmem [thread:$0]  %s101_s0, 16, %s10_s7, [#allocation1]  }
   0xc   :  { %61 = dma.done.wait [#allocation1], 16  }
   0xd   :  { %62 = vsyncadd [#allocation1], 4294967280  ;;  %v16_v0 = vld [vmem:[#allocation0] ss:$0 sm:$0xff] }
   0xe   :  { %17 = vst [vmem:[%s102_s1] sm:$0xff] %v16_v0  ;;  %33 = vst [vmem:[%s102_s1 + $0x8] sm:$0xff] %v16_v0 }
   0xf   :  { %34 = vst [vmem:[%s102_s1 + $0x10] sm:$0xff] %v16_v0  ;;  %35 = vst [vmem:[%s102_s1 + $0x18] sm:$0xff] %v16_v0 }
  0x10   :  { %36 = vst [vmem:[%s102_s1 + $0x20] sm:$0xff] %v16_v0  ;;  %37 = vst [vmem:[%s102_s1 + $0x28] sm:$0xff] %v16_v0 }
  0x11   :  { %38 = vst [vmem:[%s102_s1 + $0x30] sm:$0xff] %v16_v0  ;;  %39 = vst [vmem:[%s102_s1 + $0x38] sm:$0xff] %v16_v0 }
  0x12   :  { %32 = vsyncpa [#allocation1], 1 }

// kernel: tile.9
= control target key start
LH: loop header
LB: loop body
LE: loop exit
PB: predicated region body
PF: predicated region fallthrough
CT: control target
= control target key end

     0   :  { %vm5_vm0 = vcmask 1041409   ;;  %s428_s14 = smov 124   ;;  %s429_s21 = smov 116   ;;  %vm7_vm1 = vcmask 31744   ;;  %vm17_vm2 = vcmask 1048544   ;;  %vm27_vm3 = vcmask 1015744   ;;  %s699_s0 = inlined_call_operand.vmem [shape: f32[64,4], index: 0, kind: input, shape index: {}]   ;;  %s700_s1 = inlined_call_operand.vmem [shape: f32[1,256], index: 1, kind: output, shape index: {}]  }
   0x1   :  { %v334_v0 = vld [vmem:[%s699_s0 + $0x1f] sm:$0x1]   ;;  %v338_v3 = vld [vmem:[%s699_s0 + $0x1d] sm:$0x1]   ;;  %v336_v6 = vld [vmem:[%s699_s0 + $0x1e] sm:$0x1]  }
   0x2   :  { %v335_v1 = vld [vmem:[%s699_s0 + $0x3e] sm:$0x2]   ;;  %v339_v4 = vld [vmem:[%s699_s0 + $0x3c] sm:$0x2]   ;;  %v337_v7 = vld [vmem:[%s699_s0 + $0x3d] sm:$0x2]  }
   0x3   :  { %v14_v2 = vsel %vm5_vm0, %v335_v1, %v334_v0  ;;  %v34_v5 = vsel %vm5_vm0, %v339_v4, %v338_v3  ;;  %v340_v8 = vld [vmem:[%s699_s0 + $0x1c] sm:$0x1]   ;;  %v24_v9 = vsel %vm5_vm0, %v337_v7, %v336_v6  ;;  %v342_v12 = vld [vmem:[%s699_s0 + $0x1b] sm:$0x1]   ;;  %v344_v14 = vld [vmem:[%s699_s0 + $0x1a] sm:$0x1]  }
   0x4   :  { %15 = vrot.lane.b32.xlu0 %v14_v2, %s428_s14  ;;  %35 = vrot.lane.b32.xlu1 %v34_v5, %s429_s21  ;;  %v341_v10 = vld [vmem:[%s699_s0 + $0x3b] sm:$0x2]   ;;  %v343_v13 = vld [vmem:[%s699_s0 + $0x3a] sm:$0x2]   ;;  %s430_s3 = smov 120   ;;  %s431_s4 = smov 112  }
   0x5   :  { %v44_v11 = vsel %vm5_vm0, %v341_v10, %v340_v8  ;;  %v345_v15 = vld [vmem:[%s699_s0 + $0x39] sm:$0x2]   ;;  %v54_v16 = vsel %vm5_vm0, %v343_v13, %v342_v12  ;;  %v346_v18 = vld [vmem:[%s699_s0 + $0x19] sm:$0x1]   ;;  %v348_v20 = vld [vmem:[%s699_s0 + $0x18] sm:$0x1]  }
   0x6   :  { %v64_v17 = vsel %vm5_vm0, %v345_v15, %v344_v14  ;;  %v347_v19 = vld [vmem:[%s699_s0 + $0x38] sm:$0x2]   ;;  %v349_v21 = vld [vmem:[%s699_s0 + $0x37] sm:$0x2]   ;;  %s432_s13 = smov 108   ;;  %s433_s14 = smov 104  }
   0x7   :  { %v74_v22 = vsel %vm5_vm0, %v347_v19, %v346_v18  ;;  %v84_v23 = vsel %vm5_vm0, %v349_v21, %v348_v20  ;;  %v350_v24 = vld [vmem:[%s699_s0 + $0x17] sm:$0x1]   ;;  %v352_v26 = vld [vmem:[%s699_s0 + $0x16] sm:$0x1]   ;;  %s434_s23 = smov 100   ;;  %s435_s24 = smov 96  }
   0x8   :  { %25 = vrot.lane.b32.xlu0 %v24_v9, %s430_s3  ;;  %45 = vrot.lane.b32.xlu1 %v44_v11, %s431_s4  ;;  %v351_v25 = vld [vmem:[%s699_s0 + $0x36] sm:$0x2]   ;;  %v353_v27 = vld [vmem:[%s699_s0 + $0x35] sm:$0x2]   ;;  %s436_s4 = smov 92   ;;  %s437_s5 = smov 88  }
   0x9   :  { %v94_v28 = vsel %vm5_vm0, %v351_v25, %v350_v24  ;;  %v104_v29 = vsel %vm5_vm0, %v353_v27, %v352_v26  ;;  %v354_v30 = vld [vmem:[%s699_s0 + $0x15] sm:$0x1]   ;;  %v356_v32 = vld [vmem:[%s699_s0 + $0x14] sm:$0x1]   ;;  %v358_v36 = vld [vmem:[%s699_s0 + $0x13] sm:$0x1]  }
   0xa   :  { %v355_v31 = vld [vmem:[%s699_s0 + $0x34] sm:$0x2]   ;;  %v357_v33 = vld [vmem:[%s699_s0 + $0x33] sm:$0x2]   ;;  %v359_v37 = vld [vmem:[%s699_s0 + $0x32] sm:$0x2]  }
   0xb   :  { %v114_v34 = vsel %vm5_vm0, %v355_v31, %v354_v30  ;;  %v124_v35 = vsel %vm5_vm0, %v357_v33, %v356_v32  ;;  %v360_v38 = vld [vmem:[%s699_s0 + $0x12] sm:$0x1]   ;;  %s439_s15 = smov 80   ;;  %v134_v40 = vsel %vm5_vm0, %v359_v37, %v358_v36  ;;  %v362_v42 = vld [vmem:[%s699_s0 + $0x11] sm:$0x1]   ;;  %s441_s29 = smov 72  }
   0xc   :  { %55 = vrot.lane.b32.xlu0 %v54_v16, %s432_s13  ;;  %65 = vrot.lane.b32.xlu1 %v64_v17, %s433_s14  ;;  %v361_v39 = vld [vmem:[%s699_s0 + $0x31] sm:$0x2]   ;;  %s438_s14 = smov 84   ;;  %v363_v43 = vld [vmem:[%s699_s0 + $0x30] sm:$0x2]   ;;  %s442_s9 = smov 68  }
   0xd   :  { %v144_v41 = vsel %vm5_vm0, %v361_v39, %v360_v38  ;;  %v364_v44 = vld [vmem:[%s699_s0 + $0x10] sm:$0x1]   ;;  %v2_v46 = vld [vmem:[%s699_s0] sm:$0x1]   ;;  %v154_v48 = vsel %vm5_vm0, %v363_v43, %v362_v42  ;;  %v366_v51 = vld [vmem:[%s699_s0 + $0xf] sm:$0x1]  }
   0xe   :  { %v365_v45 = vld [vmem:[%s699_s0 + $0x2f] sm:$0x2]   ;;  %v333_v47 = vld [vmem:[%s699_s0 + $0x1f] sm:$0x2]   ;;  %v367_v52 = vld [vmem:[%s699_s0 + $0x2e] sm:$0x2]  }
   0xf   :  { %v6_v49 = vsel %vm5_vm0, %v333_v47, %v2_v46  ;;  %v164_v50 = vsel %vm5_vm0, %v365_v45, %v364_v44  ;;  %v368_v53 = vld [vmem:[%s699_s0 + $0xe] sm:$0x1]   ;;  %s443_s10 = smov 64   ;;  %v174_v55 = vsel %vm5_vm0, %v367_v52, %v366_v51  ;;  %v370_v57 = vld [vmem:[%s699_s0 + $0xd] sm:$0x1]   ;;  %s444_s19 = smov 60  }
  0x10   :  { %75 = vrot.lane.b32.xlu0 %v74_v22, %s434_s23  ;;  %85 = vrot.lane.b32.xlu1 %v84_v23, %s435_s24  ;;  %s440_s24 = smov 76   ;;  %8 = vst.msk [vmem:[#allocation0] ss:$8 sm:$0x3] %vm7_vm1, %v6_v49   ;;  %v369_v54 = vld [vmem:[%s699_s0 + $0x2d] sm:$0x2]  }
  0x11   :  { %v184_v56 = vsel %vm5_vm0, %v369_v54, %v368_v53  ;;  %v371_v58 = vld [vmem:[%s699_s0 + $0x2c] sm:$0x2]   ;;  %v372_v59 = vld [vmem:[%s699_s0 + $0xc] sm:$0x1]   ;;  %s445_s20 = smov 56   ;;  %s447_s30 = smov 48  }
  0x12   :  { %v373_v60 = vld [vmem:[%s699_s0 + $0x2b] sm:$0x2]   ;;  %v194_v61 = vsel %vm5_vm0, %v371_v58, %v370_v57  ;;  %v374_v63 = vld [vmem:[%s699_s0 + $0xb] sm:$0x1]   ;;  %v376_v1 = vld [vmem:[%s699_s0 + $0xa] sm:$0x1]  }
  0x13   :  { %v204_v62 = vsel %vm5_vm0, %v373_v60, %v372_v59  ;;  %v375_v0 = vld [vmem:[%s699_s0 + $0x2a] sm:$0x2]   ;;  %v377_v2 = vld [vmem:[%s699_s0 + $0x29] sm:$0x2]   ;;  %v378_v5 = vld [vmem:[%s699_s0 + $0x9] sm:$0x1]  }
  0x14   :  { %95 = vrot.lane.b32.xlu0 %v94_v28, %s436_s4  ;;  %105 = vrot.lane.b32.xlu1 %v104_v29, %s437_s5  ;;  %v214_v3 = vsel %vm5_vm0, %v375_v0, %v374_v63  ;;  %v224_v4 = vsel %vm5_vm0, %v377_v2, %v376_v1  ;;  %v379_v6 = vld [vmem:[%s699_s0 + $0x28] sm:$0x2]   ;;  %v380_v7 = vld [vmem:[%s699_s0 + $0x8] sm:$0x1]   ;;  %s449_s11 = smov 40   ;;  %s451_s21 = smov 32  }
  0x15   :  { %v381_v8 = vld [vmem:[%s699_s0 + $0x27] sm:$0x2]   ;;  %v234_v9 = vsel %vm5_vm0, %v379_v6, %v378_v5  ;;  %v382_v11 = vld [vmem:[%s699_s0 + $0x7] sm:$0x1]   ;;  %v384_v13 = vld [vmem:[%s699_s0 + $0x6] sm:$0x1]  }
  0x16   :  { %v244_v10 = vsel %vm5_vm0, %v381_v8, %v380_v7  ;;  %v383_v12 = vld [vmem:[%s699_s0 + $0x26] sm:$0x2]   ;;  %v385_v14 = vld [vmem:[%s699_s0 + $0x25] sm:$0x2]   ;;  %v386_v17 = vld [vmem:[%s699_s0 + $0x5] sm:$0x1]  }
  0x17   :  { %v254_v15 = vsel %vm5_vm0, %v383_v12, %v382_v11  ;;  %v264_v16 = vsel %vm5_vm0, %v385_v14, %v384_v13  ;;  %v387_v18 = vld [vmem:[%s699_s0 + $0x24] sm:$0x2]   ;;  %v388_v19 = vld [vmem:[%s699_s0 + $0x4] sm:$0x1]   ;;  %s453_s2 = smov 24   ;;  %s455_s12 = smov 16  }
  0x18   :  { %115 = vrot.lane.b32.xlu0 %v114_v34, %s438_s14  ;;  %125 = vrot.lane.b32.xlu1 %v124_v35, %s439_s15  ;;  %v389_v20 = vld [vmem:[%s699_s0 + $0x23] sm:$0x2]   ;;  %v274_v21 = vsel %vm5_vm0, %v387_v18, %v386_v17  ;;  %v390_v23 = vld [vmem:[%s699_s0 + $0x3] sm:$0x1]   ;;  %s457_s17 = smov 8   ;;  %s458_s18 = smov 4  }
  0x19   :  { %v284_v22 = vsel %vm5_vm0, %v389_v20, %v388_v19  ;;  %v391_v24 = vld [vmem:[%s699_s0 + $0x22] sm:$0x2]   ;;  %v392_v25 = vld [vmem:[%s699_s0 + $0x2] sm:$0x1]   ;;  %v394_v29 = vld [vmem:[%s699_s0 + $0x1] sm:$0x1]  }
  0x1a   :  { %v393_v26 = vld [vmem:[%s699_s0 + $0x21] sm:$0x2]   ;;  %v294_v27 = vsel %vm5_vm0, %v391_v24, %v390_v23  ;;  %v395_v30 = vld [vmem:[%s699_s0 + $0x20] sm:$0x2]   ;;  %s456_s0 = smov 12   ;;  %vm37_vm4 = vcmask 982944  }
  0x1b   :  { %v304_v28 = vsel %vm5_vm0, %v393_v26, %v392_v25  ;;  %v314_v31 = vsel %vm5_vm0, %v395_v30, %v394_v29  ;;  %vm47_vm5 = vcmask 950144   ;;  %vm57_vm6 = vcmask 917344  }
  0x1c   :  { %135 = vrot.lane.b32.xlu0 %v134_v40, %s440_s24  ;;  %145 = vrot.lane.b32.xlu1 %v144_v41, %s441_s29  ;;  %s446_s29 = smov 52   ;;  %vm67_vm7 = vcmask 884544   ;;  %vm77_vm8 = vcmask 851744   ;;  %vm87_vm9 = vcmask 818944   ;;  %vm97_vm10 = vcmask 786144  }
  0x1d   :  { %vm107_vm11 = vcmask 753344   ;;  %vm117_vm12 = vcmask 720544   ;;  %vm127_vm13 = vcmask 687744   ;;  %vm137_vm14 = vcmask 654944  }
  0x1e   :  { %vm147_vm15 = vcmask 622144   ;;  %vm157_vm0 = vcmask 589344   ;;  %vm167_vm1 = vcmask 556544  }
  0x20   :  { %155 = vrot.lane.b32.xlu0 %v154_v48, %s442_s9  ;;  %165 = vrot.lane.b32.xlu1 %v164_v50, %s443_s10  ;;  %s448_s10 = smov 44  }
  0x24   :  { %175 = vrot.lane.b32.xlu0 %v174_v55, %s444_s19  ;;  %185 = vrot.lane.b32.xlu1 %v184_v56, %s445_s20  ;;  %s450_s20 = smov 36  }
  0x28   :  { %195 = vrot.lane.b32.xlu0 %v194_v61, %s446_s29  ;;  %205 = vrot.lane.b32.xlu1 %v204_v62, %s447_s30  ;;  %s452_s30 = smov 28  }
  0x2c   :  { %215 = vrot.lane.b32.xlu0 %v214_v3, %s448_s10  ;;  %225 = vrot.lane.b32.xlu1 %v224_v4, %s449_s11  ;;  %s454_s11 = smov 20  }
  0x30   :  { %235 = vrot.lane.b32.xlu0 %v234_v9, %s450_s20  ;;  %245 = vrot.lane.b32.xlu1 %v244_v10, %s451_s21 }
  0x34   :  { %255 = vrot.lane.b32.xlu0 %v254_v15, %s452_s30  ;;  %265 = vrot.lane.b32.xlu1 %v264_v16, %s453_s2 }
  0x38   :  { %275 = vrot.lane.b32.xlu0 %v274_v21, %s454_s11  ;;  %285 = vrot.lane.b32.xlu1 %v284_v22, %s455_s12 }
  0x3c   :  { %295 = vrot.lane.b32.xlu0 %v294_v27, %s456_s0  ;;  %305 = vrot.lane.b32.xlu1 %v304_v28, %s457_s17 }
  0x40   :  { %315 = vrot.lane.b32.xlu0 %v314_v31, %s458_s18 }
  0x76   :  { %v16_v32 = vpop.permute.xlu0 %15   ;;  %v36_v33 = vpop.permute.xlu1 %35  }
  0x77   :  { %18 = vst.msk [vmem:[#allocation0] ss:$8 sm:$0x3] %vm17_vm2, %v16_v32   ;;  %vm177_vm2 = vcmask 523744  }
  0x7a   :  { %v26_v34 = vpop.permute.xlu0 %25   ;;  %v46_v35 = vpop.permute.xlu1 %45  }
  0x7b   :  { %28 = vst.msk [vmem:[#allocation0] ss:$8 sm:$0x3] %vm27_vm3, %v26_v34   ;;  %vm187_vm3 = vcmask 490944  }
  0x7c   :  { %38 = vst.msk [vmem:[#allocation0] ss:$8 sm:$0x3] %vm37_vm4, %v36_v33   ;;  %vm197_vm4 = vcmask 458144  }
  0x7d   :  { %48 = vst.msk [vmem:[#allocation0] ss:$8 sm:$0x3] %vm47_vm5, %v46_v35   ;;  %vm207_vm5 = vcmask 425344  }
  0x7e   :  { %v56_v36 = vpop.permute.xlu0 %55   ;;  %v66_v37 = vpop.permute.xlu1 %65  }
  0x7f   :  { %58 = vst.msk [vmem:[#allocation0] ss:$8 sm:$0x3] %vm57_vm6, %v56_v36   ;;  %vm217_vm6 = vcmask 392544  }
  0x80   :  { %68 = vst.msk [vmem:[#allocation0] ss:$8 sm:$0x3] %vm67_vm7, %v66_v37   ;;  %vm227_vm7 = vcmask 359744  }
  0x82   :  { %v76_v38 = vpop.permute.xlu0 %75   ;;  %v86_v39 = vpop.permute.xlu1 %85  }
  0x83   :  { %78 = vst.msk [vmem:[#allocation0] ss:$8 sm:$0x3] %vm77_vm8, %v76_v38   ;;  %vm237_vm8 = vcmask 326944  }
  0x84   :  { %88 = vst.msk [vmem:[#allocation0] ss:$8 sm:$0x3] %vm87_vm9, %v86_v39   ;;  %vm247_vm9 = vcmask 294144  }
  0x86   :  { %v96_v40 = vpop.permute.xlu0 %95   ;;  %v106_v41 = vpop.permute.xlu1 %105  }
  0x87   :  { %98 = vst.msk [vmem:[#allocation0] ss:$8 sm:$0x3] %vm97_vm10, %v96_v40   ;;  %vm257_vm10 = vcmask 261344  }
  0x88   :  { %108 = vst.msk [vmem:[#allocation0] ss:$8 sm:$0x3] %vm107_vm11, %v106_v41   ;;  %vm267_vm11 = vcmask 228544  }
  0x8a   :  { %v116_v42 = vpop.permute.xlu0 %115   ;;  %v126_v43 = vpop.permute.xlu1 %125  }
  0x8b   :  { %118 = vst.msk [vmem:[#allocation0] ss:$8 sm:$0x3] %vm117_vm12, %v116_v42   ;;  %vm277_vm12 = vcmask 195744  }
  0x8c   :  { %128 = vst.msk [vmem:[#allocation0] ss:$8 sm:$0x3] %vm127_vm13, %v126_v43   ;;  %vm287_vm13 = vcmask 162944  }
  0x8e   :  { %v136_v44 = vpop.permute.xlu0 %135   ;;  %v146_v45 = vpop.permute.xlu1 %145  }
  0x8f   :  { %138 = vst.msk [vmem:[#allocation0] ss:$8 sm:$0x3] %vm137_vm14, %v136_v44   ;;  %vm297_vm14 = vcmask 130144  }
  0x90   :  { %148 = vst.msk [vmem:[#allocation0] ss:$8 sm:$0x3] %vm147_vm15, %v146_v45   ;;  %vm307_vm15 = vcmask 97344  }
  0x92   :  { %v156_v46 = vpop.permute.xlu0 %155   ;;  %v166_v47 = vpop.permute.xlu1 %165  }
  0x93   :  { %158 = vst.msk [vmem:[#allocation0] ss:$8 sm:$0x3] %vm157_vm0, %v156_v46   ;;  %vm317_vm0 = vcmask 64544  }
  0x94   :  { %168 = vst.msk [vmem:[#allocation0] ss:$8 sm:$0x3] %vm167_vm1, %v166_v47  }
  0x96   :  { %v176_v48 = vpop.permute.xlu0 %175   ;;  %v186_v49 = vpop.permute.xlu1 %185  }
  0x97   :  { %178 = vst.msk [vmem:[#allocation0] ss:$8 sm:$0x3] %vm177_vm2, %v176_v48  }
  0x98   :  { %188 = vst.msk [vmem:[#allocation0] ss:$8 sm:$0x3] %vm187_vm3, %v186_v49  }
  0x9a   :  { %v196_v50 = vpop.permute.xlu0 %195   ;;  %v206_v51 = vpop.permute.xlu1 %205  }
  0x9b   :  { %198 = vst.msk [vmem:[#allocation0] ss:$8 sm:$0x3] %vm197_vm4, %v196_v50  }
  0x9c   :  { %208 = vst.msk [vmem:[#allocation0] ss:$8 sm:$0x3] %vm207_vm5, %v206_v51  }
  0x9e   :  { %v216_v52 = vpop.permute.xlu0 %215   ;;  %v226_v53 = vpop.permute.xlu1 %225  }
  0x9f   :  { %218 = vst.msk [vmem:[#allocation0] ss:$8 sm:$0x3] %vm217_vm6, %v216_v52  }
  0xa0   :  { %228 = vst.msk [vmem:[#allocation0] ss:$8 sm:$0x3] %vm227_vm7, %v226_v53  }
  0xa2   :  { %v236_v54 = vpop.permute.xlu0 %235   ;;  %v246_v55 = vpop.permute.xlu1 %245  }
  0xa3   :  { %238 = vst.msk [vmem:[#allocation0] ss:$8 sm:$0x3] %vm237_vm8, %v236_v54  }
  0xa4   :  { %248 = vst.msk [vmem:[#allocation0] ss:$8 sm:$0x3] %vm247_vm9, %v246_v55  }
  0xa6   :  { %v256_v56 = vpop.permute.xlu0 %255   ;;  %v266_v57 = vpop.permute.xlu1 %265  }
  0xa7   :  { %258 = vst.msk [vmem:[#allocation0] ss:$8 sm:$0x3] %vm257_vm10, %v256_v56  }
  0xa8   :  { %268 = vst.msk [vmem:[#allocation0] ss:$8 sm:$0x3] %vm267_vm11, %v266_v57  }
  0xaa   :  { %v276_v58 = vpop.permute.xlu0 %275   ;;  %v286_v59 = vpop.permute.xlu1 %285  }
  0xab   :  { %278 = vst.msk [vmem:[#allocation0] ss:$8 sm:$0x3] %vm277_vm12, %v276_v58  }
  0xac   :  { %288 = vst.msk [vmem:[#allocation0] ss:$8 sm:$0x3] %vm287_vm13, %v286_v59  }
  0xae   :  { %v296_v60 = vpop.permute.xlu0 %295   ;;  %v306_v61 = vpop.permute.xlu1 %305  }
  0xaf   :  { %298 = vst.msk [vmem:[#allocation0] ss:$8 sm:$0x3] %vm297_vm14, %v296_v60  }
  0xb0   :  { %308 = vst.msk [vmem:[#allocation0] ss:$8 sm:$0x3] %vm307_vm15, %v306_v61  }
  0xb2   :  { %v316_v62 = vpop.permute.xlu0 %315  }
  0xb3   :  { %318 = vst.msk [vmem:[#allocation0] ss:$8 sm:$0x3] %vm317_vm0, %v316_v62  }
  0xba   :  { %v323_v63 = vld [vmem:[#allocation0] sm:$0x1]  ;;  %v328_v0 = vld [vmem:[#allocation0 + $0x8] sm:$0x1] }
  0xbb   :  { %326 = vst [vmem:[%s700_s1] sm:$0x1] %v323_v63  ;;  %396 = vst [vmem:[%s700_s1 + $0x1] sm:$0x1] %v328_v0 }

// kernel: upsample_forward.1
= control target key start
LH: loop header
LB: loop body
LE: loop exit
PB: predicated region body
PF: predicated region fallthrough
CT: control target
= control target key end

     0   :  { %s675_s12 = smov 0   ;;  %s891_s0 = inlined_call_operand.vmem [shape: f32[2,18,72], index: 0, kind: input, shape index: {}]   ;;  %s892_s1 = inlined_call_operand.vmem [shape: f32[3,72,256], index: 1, kind: input, shape index: {}]   ;;  %s893_s2 = inlined_call_operand.vmem [shape: f32[1,256], index: 2, kind: input, shape index: {}]   ;;  %s894_s3 = inlined_call_operand.vmem [shape: f32[2,2,16,128], index: 3, kind: output, shape index: {}]  }
   0x1 LB: > { %s563_s13 = sadd.s32 4294967295, %s652_s12   ;;  %p567_p0 = scmp.ge.s32.totalorder %s652_s12, 1  ;;  %s652_s12 = sphi %s675_s12, %s13_s12  }
   0x2   : > { %p137_p1 = scmp.lt.s32.totalorder %s652_s12, 3 }
   0x4   : > { %p138_p2 = pnand %p567_p0, %p137_p1 }
   0x5   : > { %p712_p3 = scmp.lt.s32.totalorder (!%p138_p2), %s563_s13, 1 }
   0x6   : > { %141 = sbr.rel (%p138_p2) target bundleno = 253 (0xfd), region = 32 }
   0xb   : > { %v588_v0 = vld [vmem:[%s892_s1 + $0x118] sm:$0xff]  ;;  %v190_v1 = vld [vmem:[%s892_s1 + $0x88] sm:$0xff]  ;;  %v587_v2 = vld [vmem:[%s892_s1 + $0x110] sm:$0xff]  ;;  %s897_s13 = smov (!%p712_p3, %s563_s13), 1  ;;  %vm212_vm0 = vcmask 588800   ;;  %v654_v38 = vmov 0.0   ;;  %v489_v61 = vlaneseq }
   0xc   : > { %233 = vmatprep.subr.mxu0 %v588_v0  ;;  %316 = vmatprep.subr.mxu1 %v190_v1  ;;  %v189_v3 = vld [vmem:[%s892_s1 + $0x80] sm:$0xff]  ;;  %v586_v4 = vld [vmem:[%s892_s1 + $0x108] sm:$0xff]  ;;  %v188_v5 = vld [vmem:[%s892_s1 + $0x78] sm:$0xff]  ;;  %s636_s17 = smul.u32 24, %s897_s13  ;;  %s617_s29 = sshll.u32 %s897_s13, 5 }
   0xd   : > { %234 = vmatpush1.msra.mxu0 %v587_v2  ;;  %317 = vmatpush1.msra.mxu1 %v189_v3  ;;  %v585_v6 = vld [vmem:[%s892_s1 + $0x100] sm:$0xff]  ;;  %v187_v7 = vld [vmem:[%s892_s1 + $0x70] sm:$0xff]  ;;  %v584_v8 = vld [vmem:[%s892_s1 + $0xf8] sm:$0xff]  ;;  %v490_v0 = vshrl.u32 %v489_v61, 7  ;;  %s170_s5 = scalar_lea.vmem %s894_s3, %s617_s29 }
   0xe   : > { %235 = vmatprep.subr.mxu0 %v586_v4  ;;  %318 = vmatprep.subr.mxu1 %v188_v5  ;;  %v186_v9 = vld [vmem:[%s892_s1 + $0x68] sm:$0xff]  ;;  %v583_v10 = vld [vmem:[%s892_s1 + $0xf0] sm:$0xff]  ;;  %v185_v11 = vld [vmem:[%s892_s1 + $0x60] sm:$0xff]  ;;  %s801_s9 = scalar_lea.vmem %s891_s0, %s636_s17 }
   0xf   : > { %236 = vmatpush1.msra.mxu0 %v585_v6  ;;  %319 = vmatpush1.msra.mxu1 %v187_v7  ;;  %v582_v12 = vld [vmem:[%s892_s1 + $0xe8] sm:$0xff]  ;;  %v184_v13 = vld [vmem:[%s892_s1 + $0x58] sm:$0xff]  ;;  %v581_v14 = vld [vmem:[%s892_s1 + $0xe0] sm:$0xff]  ;;  %v491_v5 = vsub.s32 0, %v490_v0  ;;  %v495_v7 = vsub.s32 1, %v490_v0 }
  0x10   : > { %237 = vmatprep.subr.mxu0 %v584_v8  ;;  %320 = vmatprep.subr.mxu1 %v186_v9  ;;  %v183_v15 = vld [vmem:[%s892_s1 + $0x50] sm:$0xff]  ;;  %v580_v16 = vld [vmem:[%s892_s1 + $0xd8] sm:$0xff]  ;;  %v182_v17 = vld [vmem:[%s892_s1 + $0x48] sm:$0xff] }
  0x11   : > { %238 = vmatpush1.msra.mxu0 %v583_v10  ;;  %321 = vmatpush1.msra.mxu1 %v185_v11  ;;  %v579_v18 = vld [vmem:[%s892_s1 + $0xd0] sm:$0xff]  ;;  %v181_v19 = vld [vmem:[%s892_s1 + $0x40] sm:$0xff]  ;;  %v578_v20 = vld [vmem:[%s892_s1 + $0xc8] sm:$0xff] }
  0x12   : > { %239 = vmatprep.subr.mxu0 %v582_v12  ;;  %322 = vmatprep.subr.mxu1 %v184_v13  ;;  %v180_v21 = vld [vmem:[%s892_s1 + $0x38] sm:$0xff]  ;;  %v577_v22 = vld [vmem:[%s892_s1 + $0xc0] sm:$0xff]  ;;  %v179_v23 = vld [vmem:[%s892_s1 + $0x30] sm:$0xff] }
  0x13   : > { %240 = vmatpush1.msra.mxu0 %v581_v14  ;;  %323 = vmatpush1.msra.mxu1 %v183_v15  ;;  %v576_v24 = vld [vmem:[%s892_s1 + $0xb8] sm:$0xff]  ;;  %v178_v25 = vld [vmem:[%s892_s1 + $0x28] sm:$0xff]  ;;  %v575_v26 = vld [vmem:[%s892_s1 + $0xb0] sm:$0xff] }
  0x14   : > { %241 = vmatprep.subr.mxu0 %v580_v16  ;;  %324 = vmatprep.subr.mxu1 %v182_v17  ;;  %v177_v27 = vld [vmem:[%s892_s1 + $0x20] sm:$0xff]  ;;  %v574_v28 = vld [vmem:[%s892_s1 + $0xa8] sm:$0xff]  ;;  %v176_v29 = vld [vmem:[%s892_s1 + $0x18] sm:$0xff] }
  0x15   : > { %242 = vmatpush1.msra.mxu0 %v579_v18  ;;  %325 = vmatpush1.msra.mxu1 %v181_v19  ;;  %v573_v30 = vld [vmem:[%s892_s1 + $0xa0] sm:$0xff]  ;;  %v175_v31 = vld [vmem:[%s892_s1 + $0x10] sm:$0xff]  ;;  %v572_v32 = vld [vmem:[%s892_s1 + $0x98] sm:$0xff] }
  0x16   : > { %243 = vmatprep.subr.mxu0 %v578_v20  ;;  %326 = vmatprep.subr.mxu1 %v180_v21  ;;  %v174_v33 = vld [vmem:[%s892_s1 + $0x8] sm:$0xff]  ;;  %v571_v34 = vld [vmem:[%s892_s1 + $0x90] sm:$0xff]  ;;  %v173_v35 = vld [vmem:[%s892_s1] sm:$0xff] }
  0x17   : > { %244 = vmatpush1.msra.mxu0 %v577_v22  ;;  %327 = vmatpush1.msra.mxu1 %v179_v23  ;;  %v191_v36 = vld [vmem:[%s801_s9 + $0x1] sm:$0xff]  ;;  %v608_v41 = vld [vmem:[%s892_s1 + $0x198] sm:$0xff]  ;;  %v607_v42 = vld [vmem:[%s892_s1 + $0x190] sm:$0xff] }
  0x18   : > { %245 = vmatprep.subr.mxu0 %v576_v24  ;;  %328 = vmatprep.subr.mxu1 %v178_v25  ;;  %v171_v37 = vld [vmem:[%s801_s9] sm:$0xff]  ;;  %v610_v39 = vld [vmem:[%s892_s1 + $0x1a8] sm:$0xff]  ;;  %v604_v45 = vld [vmem:[%s892_s1 + $0x178] sm:$0xff] }
  0x19   : > { %246 = vmatpush1.msra.mxu0 %v575_v26  ;;  %329 = vmatpush1.msra.mxu1 %v177_v27  ;;  %v609_v40 = vld [vmem:[%s892_s1 + $0x1a0] sm:$0xff]  ;;  %v606_v43 = vld [vmem:[%s892_s1 + $0x188] sm:$0xff]  ;;  %v603_v46 = vld [vmem:[%s892_s1 + $0x170] sm:$0xff] }
  0x1a   : > { %247 = vmatprep.subr.mxu0 %v574_v28  ;;  %330 = vmatprep.subr.mxu1 %v176_v29  ;;  %v605_v44 = vld [vmem:[%s892_s1 + $0x180] sm:$0xff]  ;;  %v602_v47 = vld [vmem:[%s892_s1 + $0x168] sm:$0xff]  ;;  %v600_v49 = vld [vmem:[%s892_s1 + $0x158] sm:$0xff] }
  0x1b   : > { %248 = vmatpush1.msra.mxu0 %v573_v30  ;;  %331 = vmatpush1.msra.mxu1 %v175_v31  ;;  %v601_v48 = vld [vmem:[%s892_s1 + $0x160] sm:$0xff]  ;;  %v599_v50 = vld [vmem:[%s892_s1 + $0x150] sm:$0xff]  ;;  %v172_v52 = vld [vmem:[%s801_s9 + $0x8] sm:$0xff] }
  0x1c   : > { %249 = vmatprep.subr.mxu0 %v572_v32  ;;  %332 = vmatprep.subr.mxu1 %v174_v33  ;;  %v192_v51 = vld [vmem:[%s801_s9 + $0x9] sm:$0xff]  ;;  %v597_v54 = vld [vmem:[%s892_s1 + $0x140] sm:$0xff]  ;;  %v596_v55 = vld [vmem:[%s892_s1 + $0x138] sm:$0xff] }
  0x1d   : > { %250 = vmatpush1.msra.mxu0 %v571_v34  ;;  %283 = vmatprep.mubr.f32.mxu0 %v654_v38  ;;  %v598_v53 = vld [vmem:[%s892_s1 + $0x148] sm:$0xff]  ;;  %v595_v56 = vld [vmem:[%s892_s1 + $0x130] sm:$0xff]  ;;  %v593_v58 = vld [vmem:[%s892_s1 + $0x120] sm:$0xff] }
  0x1e   : > { %333 = vmatpush1.msra.mxu1 %v173_v35  ;;  %366 = vmatprep.mubr.f32.mxu1 %v654_v38  ;;  %v594_v57 = vld [vmem:[%s892_s1 + $0x128] sm:$0xff]  ;;  %v487_v6 = vld [vmem:[%s893_s2] sm:$0x3] }
  0x1f   : > { %589 = vmatmul.mubr.msk.f32.vlgmr.msra.gmra.mxu0 %vm212_vm0, %v191_v36  ;;  %591 = vmatmul.mubr.msk.f32.vlgmr.msra.gmra.mxu1 %vm212_vm0, %v171_v37  ;;  %v379_v59 = vld [vmem:[%s801_s9 + $0x2] sm:$0xff]  ;;  %v380_v60 = vld [vmem:[%s801_s9 + $0xa] sm:$0xff]  ;;  %v492_v12 = vrot.slane %v487_v6, %v491_v5  ;;  %v496_v15 = vrot.slane %v487_v6, %v495_v7 }
  0x20   : > { %420 = vmatprep.subr.mxu0 %v610_v39  ;;  %618 = vmatprep.subr.mxu1 %v610_v39 }
  0x21   : > { %421 = vmatpush1.msra.mxu0 %v609_v40  ;;  %627 = vmatpush1.msra.mxu1 %v609_v40 }
  0x22   : > { %422 = vmatprep.subr.mxu0 %v608_v41  ;;  %619 = vmatprep.subr.mxu1 %v608_v41 }
  0x23   : > { %423 = vmatpush1.msra.mxu0 %v607_v42  ;;  %628 = vmatpush1.msra.mxu1 %v607_v42 }
  0x24   : > { %424 = vmatprep.subr.mxu0 %v606_v43  ;;  %620 = vmatprep.subr.mxu1 %v606_v43 }
  0x25   : > { %425 = vmatpush1.msra.mxu0 %v605_v44  ;;  %629 = vmatpush1.msra.mxu1 %v605_v44 }
  0x26   : > { %426 = vmatprep.subr.mxu0 %v604_v45  ;;  %621 = vmatprep.subr.mxu1 %v604_v45 }
  0x27   : > { %427 = vmatpush1.msra.mxu0 %v603_v46  ;;  %630 = vmatpush1.msra.mxu1 %v603_v46 }
  0x28   : > { %428 = vmatprep.subr.mxu0 %v602_v47  ;;  %622 = vmatprep.subr.mxu1 %v602_v47 }
  0x29   : > { %429 = vmatpush1.msra.mxu0 %v601_v48  ;;  %631 = vmatpush1.msra.mxu1 %v601_v48 }
  0x2a   : > { %430 = vmatprep.subr.mxu0 %v600_v49  ;;  %623 = vmatprep.subr.mxu1 %v600_v49 }
  0x2b   : > { %289 = vmatprep.mubr.f32.mxu0 %v654_v38  ;;  %372 = vmatprep.mubr.f32.mxu1 %v654_v38 }
  0x2c   : > { %431 = vmatpush1.msra.mxu0 %v599_v50  ;;  %632 = vmatpush1.msra.mxu1 %v599_v50 }
  0x2d   : > { %590 = vmatmul.mubr.msk.f32.gmra.mxu0 %vm212_vm0, %v192_v51  ;;  %592 = vmatmul.mubr.msk.f32.gmra.mxu1 %vm212_vm0, %v172_v52 }
  0x2e   : > { %432 = vmatprep.subr.mxu0 %v598_v53  ;;  %624 = vmatprep.subr.mxu1 %v598_v53 }
  0x2f   : > { %433 = vmatpush1.msra.mxu0 %v597_v54  ;;  %633 = vmatpush1.msra.mxu1 %v597_v54 }
  0x30   : > { %434 = vmatprep.subr.mxu0 %v596_v55  ;;  %625 = vmatprep.subr.mxu1 %v596_v55 }
  0x31   : > { %435 = vmatpush1.msra.mxu0 %v595_v56  ;;  %634 = vmatpush1.msra.mxu1 %v595_v56 }
  0x32   : > { %436 = vmatprep.subr.mxu0 %v594_v57  ;;  %626 = vmatprep.subr.mxu1 %v594_v57 }
  0x33   : > { %437 = vmatpush1.msra.mxu0 %v593_v58  ;;  %635 = vmatpush1.msra.mxu1 %v593_v58 }
  0x34   : > { %470 = vmatprep.mubr.f32.mxu0 %v654_v38  ;;  %476 = vmatprep.mubr.f32.mxu1 %v654_v38 }
  0x35   : > { %611 = vmatmul.mubr.msk.f32.vlgmr.msra.gmra.mxu0 %vm212_vm0, %v379_v59  ;;  %612 = vmatmul.mubr.msk.f32.vlgmr.msra.gmra.mxu1 %vm212_vm0, %v380_v60 }
  0xdf   : > { %v285_v62 = vpop.f32.mrf.mxu0  ;;  %v368_v63 = vpop.f32.mrf.mxu1 }
  0xe0   : > { %v369_v10 = vadd.f32 %v368_v63, %v285_v62 }
  0xe1   : > { %v287_v1 = vpop.f32.mrf.mxu0  ;;  %v370_v2 = vpop.f32.mrf.mxu1 }
  0xe2   : > { %v371_v16 = vadd.f32 %v370_v2, %v287_v1 }
  0xed   : > { %v291_v3 = vpop.f32.mrf.mxu0  ;;  %v374_v4 = vpop.f32.mrf.mxu1 }
  0xee   : > { %v375_v11 = vadd.f32 %v374_v4, %v291_v3 }
  0xef   : > { %v293_v8 = vpop.f32.mrf.mxu0  ;;  %v376_v9 = vpop.f32.mrf.mxu1 }
  0xf0   : > { %v377_v17 = vadd.f32 %v376_v9, %v293_v8 }
  0xf5   : > { %v472_v13 = vpop.f32.mrf.mxu0  ;;  %v478_v14 = vpop.f32.mrf.mxu1 }
  0xf6   : > { %v483_v18 = vadd.f32 %v472_v13, %v369_v10  ;;  %v485_v19 = vadd.f32 %v478_v14, %v375_v11 }
  0xf7   : > { %v474_v20 = vpop.f32.mrf.mxu0  ;;  %v480_v21 = vpop.f32.mrf.mxu1 }
  0xf8   : > { %v499_v22 = vadd.f32 %v492_v12, %v483_v18  ;;  %v501_v23 = vadd.f32 %v492_v12, %v485_v19  ;;  %v484_v24 = vadd.f32 %v474_v20, %v371_v16  ;;  %v486_v25 = vadd.f32 %v480_v21, %v377_v17 }
  0xfa   : > { %503 = vst [vmem:[%s170_s5] sm:$0xff] %v499_v22  ;;  %504 = vst [vmem:[%s170_s5 + $0x8] sm:$0xff] %v501_v23  ;;  %v500_v26 = vadd.f32 %v496_v15, %v484_v24  ;;  %v502_v27 = vadd.f32 %v496_v15, %v486_v25 }
  0xfc   : > { %613 = vst [vmem:[%s170_s5 + $0x10] sm:$0xff] %v500_v26  ;;  %614 = vst [vmem:[%s170_s5 + $0x18] sm:$0xff] %v502_v27 }
  0xfd PF: > { %s13_s12 = sadd.s32 1, %s652_s12  }
  0xfe   : > { %p10_p4 = scmp.ge.s32.totalorder %s13_s12, 4  }
 0x100   :  { %12 = sbr.rel (!%p10_p4) target bundleno = 1 (0x1), region = 65 }

</bundles_post_ra>
